<compile_context>
chip_gen: v7x
topology: tpu7x:2x2x1
jax: 0.10.0
libtpu: 0.0.40
codegen_flags: <defaults>
</compile_context>

<pallas_src>
import functools

import jax
import jax.numpy as jnp
from jax.experimental import pallas as pl
from jax.experimental.pallas import tpu as pltpu


def _round_up(x, m):
    return ((x + m - 1) // m) * m


def _vmem_limit_bytes():
    """Generation-aware VMEM limit (v5e/v6e: 128 MiB physical, v7x: 64 MiB/TC)."""
    cap = 64 * 1024 * 1024
    try:
        info = pltpu.get_tpu_info()
        cap = int(getattr(info, "vmem_capacity_bytes", cap))
    except Exception:
        pass
    return max(16 * 1024 * 1024, min(cap // 2, 64 * 1024 * 1024))


# ---------------------------------------------------------------------------
# Kernels
# ---------------------------------------------------------------------------

def _shared_kernel(x_ref, w_ref, b_ref, o_ref, *, tile_b, compute_dtype):
    """Shared projection on the native [B, S, V] layout.

    x_ref: (tile_b, S, V)   w_ref: (P, S)   b_ref: (P, 1)   o_ref: (tile_b, P, V)
    out[b] = W @ x[b]   (bf16/f32 MXU operands, f32 accumulation + f32 bias)
    """
    w = w_ref[...].astype(compute_dtype)
    b = b_ref[...]                                         # (P, 1) float32
    for i in range(tile_b):                                # static unroll, tile_b <= 8
        y = jnp.dot(w, x_ref[i].astype(compute_dtype),
                    preferred_element_type=jnp.float32)    # (P, V) f32
        o_ref[i] = (y + b).astype(o_ref.dtype)


def _pervar_kernel(x_ref, w_ref, b_ref, o_ref, *, compute_dtype):
    """Per-variable projections, vt variables per grid step.

    x_ref: (vt, tile_b, S)  w_ref: (vt, S, P_pad)  b_ref: (vt, 1, P_pad)
    """
    y = jnp.einsum("vbs,vsp->vbp",
                   x_ref[...].astype(compute_dtype),
                   w_ref[...].astype(compute_dtype),
                   preferred_element_type=jnp.float32)
    o_ref[...] = (y + b_ref[...]).astype(o_ref.dtype)


# ---------------------------------------------------------------------------
# Forward wrapper
# ---------------------------------------------------------------------------

@functools.partial(jax.jit, static_argnames=("shared_proj", "compute_dtype"))
def ltsf_linear_forward(x_enc, weight, bias, *, shared_proj,
                        compute_dtype=jnp.bfloat16):
    """
    x_enc : [B, seq_len, n_vars]
    weight: [1, pred_len, seq_len] if shared_proj else [n_vars, pred_len, seq_len]
    bias  : [1, 1, pred_len] or [n_vars, 1, pred_len]   (PyTorch nn.Linear layout)
    returns [B, pred_len, n_vars]

    compute_dtype: dtype fed to the MXU (cast inside the kernel); accumulation
    and bias add are always float32.
    """
    B, seq_len, n_vars = x_enc.shape
    pred_len = weight.shape[1]
    out_dtype = x_enc.dtype
    itemsize = jnp.dtype(out_dtype).itemsize
    vmem_limit = _vmem_limit_bytes()
    tile_budget = (vmem_limit * 3) // 4            # headroom for compiler scratch

    flops = 2 * B * pred_len * seq_len * n_vars

    if shared_proj:
        # out[b] = W(P,S) @ x[b](S,V) on the native layout: no transposes of x
        # or of the output, weight + bias stay VMEM-resident across the grid.
        w2d = weight[0]                             # (P, S)
        b2d = bias[0, 0][:, None]                   # (P, 1) float32

        per_b = itemsize * n_vars * (seq_len + pred_len)      # x + out rows
        fixed = 2 * pred_len * seq_len * 4 + pred_len * 4     # W (dbl-buf) + bias
        cands = [d for d in range(1, min(B, 8) + 1) if B % d == 0]
        tile_b = 1
        for d in cands:
            if fixed + 2 * d * per_b <= tile_budget:
                tile_b = d
        # keep >= 2 grid steps when possible (v7x has 2 TensorCores)
        if B // tile_b < 2 and B >= 2:
            smaller = [d for d in cands if d <= B // 2]
            if smaller:
                tile_b = max(smaller)

        bytes_accessed = (B * seq_len * n_vars * itemsize
                          + pred_len * seq_len * 4 + pred_len * 4
                          + B * pred_len * n_vars * itemsize)

        return pl.pallas_call(
            functools.partial(_shared_kernel, tile_b=tile_b,
                              compute_dtype=compute_dtype),
            out_shape=jax.ShapeDtypeStruct((B, pred_len, n_vars), out_dtype),
            grid=(B // tile_b,),
            in_specs=[
                pl.BlockSpec((tile_b, seq_len, n_vars), lambda i: (i, 0, 0)),
                pl.BlockSpec((pred_len, seq_len), lambda i: (0, 0)),
                pl.BlockSpec((pred_len, 1), lambda i: (0, 0)),
            ],
            out_specs=pl.BlockSpec((tile_b, pred_len, n_vars),
                                   lambda i: (i, 0, 0)),
            compiler_params=pltpu.CompilerParams(
                dimension_semantics=("parallel",),
                vmem_limit_bytes=vmem_limit),
            cost_estimate=pl.CostEstimate(flops=flops, transcendentals=0,
                                          bytes_accessed=bytes_accessed),
        )(x_enc, w2d, b2d)

    # ----- per-variable projections -----------------------------------------
    # TODO(synk): if the surrounding model keeps a channel-first [V, B, S]
    # activation layout, this transpose (and the final one) fuses away.
    x_t = jnp.transpose(x_enc, (2, 0, 1))                   # [V, B, S]
    p_pad = _round_up(pred_len, 128)                        # lane-dense stores
    w_t = jnp.transpose(weight, (0, 2, 1))                  # [V, S, P]
    w_t = jnp.pad(w_t, ((0, 0), (0, 0), (0, p_pad - pred_len)))
    b_t = jnp.pad(bias, ((0, 0), (0, 0), (0, p_pad - pred_len)))

    # Batch tile: full B for small batches (big-M matmuls per step).
    w_blk = seq_len * p_pad * 4                             # per-var weight block
    tile_b = B if B <= 512 else 256
    while tile_b > 8 and 2 * (w_blk + itemsize * tile_b * (seq_len + p_pad)) > tile_budget:
        tile_b = max(8, _round_up(tile_b // 2, 8))
    b_pad = _round_up(B, tile_b)
    b_steps = b_pad // tile_b

    # Variables per step: fit the double-buffered VMEM budget, then trade
    # padded-weight bytes against per-step overhead (~0.35 us of HBM time).
    def _foot(vt):
        return 2 * (vt * w_blk + itemsize * vt * tile_b * (seq_len + p_pad))
    vt_max = 1
    for cand in range(1, min(n_vars, 16) + 1):
        if _foot(cand) <= tile_budget:
            vt_max = cand
    step_cost = 400 * 1024
    vt, best_cost = 1, None
    for cand in range(1, vt_max + 1):
        v_p = _round_up(n_vars, cand)
        cost = v_p * w_blk + (v_p // cand) * b_steps * step_cost
        if best_cost is None or cost < best_cost:
            vt, best_cost = cand, cost
    # keep >= 2 grid steps when possible (v7x has 2 TensorCores)
    if n_vars >= 2 and (_round_up(n_vars, vt) // vt) * b_steps < 2:
        vt = (n_vars + 1) // 2
    v_pad = _round_up(n_vars, vt)

    x3d = jnp.pad(x_t, ((0, v_pad - n_vars), (0, b_pad - B), (0, 0)))
    w3d = jnp.pad(w_t, ((0, v_pad - n_vars), (0, 0), (0, 0)))
    b3d = jnp.pad(b_t, ((0, v_pad - n_vars), (0, 0), (0, 0)))

    bytes_accessed = (v_pad * b_pad * seq_len * itemsize
                      + v_pad * seq_len * p_pad * 4 + v_pad * p_pad * 4
                      + v_pad * b_pad * p_pad * itemsize)

    out = pl.pallas_call(
        functools.partial(_pervar_kernel, compute_dtype=compute_dtype),
        out_shape=jax.ShapeDtypeStruct((v_pad, b_pad, p_pad), out_dtype),
        grid=(v_pad // vt, b_pad // tile_b),
        in_specs=[
            pl.BlockSpec((vt, tile_b, seq_len), lambda v, b: (v, b, 0)),
            pl.BlockSpec((vt, seq_len, p_pad), lambda v, b: (v, 0, 0)),
            pl.BlockSpec((vt, 1, p_pad), lambda v, b: (v, 0, 0)),
        ],
        out_specs=pl.BlockSpec((vt, tile_b, p_pad), lambda v, b: (v, b, 0)),
        compiler_params=pltpu.CompilerParams(
            dimension_semantics=("parallel", "parallel"),
            vmem_limit_bytes=vmem_limit),
        cost_estimate=pl.CostEstimate(flops=flops, transcendentals=0,
                                      bytes_accessed=bytes_accessed),
    )(x3d, w3d, b3d)

    out = out[:n_vars, :B, :pred_len]
    return jnp.transpose(out, (1, 2, 0))                    # [B, P, V]


# ---------------------------------------------------------------------------
# Reference + self-test
# ---------------------------------------------------------------------------

def _init_linear_params(key, n_proj, seq_len, pred_len):
    """Deterministic init mimicking nn.Linear's uniform(-1/sqrt(fan_in), +)."""
    kw, kb = jax.random.split(key)
    bound = 1.0 / float(seq_len) ** 0.5
    weight = jax.random.uniform(
        kw, (n_proj, pred_len, seq_len), jnp.float32, -bound, bound)
    bias = jax.random.uniform(
        kb, (n_proj, 1, pred_len), jnp.float32, -bound, bound)
    return weight, bias


def _reference(x_enc, weight, bias, shared_proj):
    """Pure-JAX reference mirroring the PyTorch forward."""
    B, seq_len, n_vars = x_enc.shape
    if shared_proj:
        w = weight[0]      # (pred_len, seq_len)
        b = bias[0, 0]     # (pred_len,)
        y = jnp.einsum("bsv,ps->bvp", x_enc, w) + b
        return jnp.transpose(y, (0, 2, 1))
    outs = [x_enc[:, :, ix] @ weight[ix].T + bias[ix, 0] for ix in range(n_vars)]
    return jnp.stack(outs, axis=2)


if __name__ == "__main__":
    configs = [
        dict(B=2, seq_len=8, pred_len=12, n_vars=4),     # tiny smoke test
        dict(B=4, seq_len=96, pred_len=32, n_vars=7),    # exercises padding/tiling
    ]
    key = jax.random.PRNGKey(0)
    ok = True
    for cfg in configs:
        B, S, P, V = cfg["B"], cfg["seq_len"], cfg["pred_len"], cfg["n_vars"]
        key, kx, kshared, kpervar = jax.random.split(key, 4)
        x_enc = jax.random.normal(kx, (B, S, V), jnp.float32)
        for shared_proj, kparam in ((True, kshared), (False, kpervar)):
            n_proj = 1 if shared_proj else V
            weight, bias = _init_linear_params(kparam, n_proj, S, P)
            ref = _reference(x_enc, weight, bias, shared_proj)
            for cd, atol, rtol in ((jnp.float32, 1e-5, 1e-5),
                                   (jnp.bfloat16, 5e-2, 5e-2)):
                out = ltsf_linear_forward(x_enc, weight, bias,
                                          shared_proj=shared_proj,
                                          compute_dtype=cd)
                out = jax.block_until_ready(out)
                if out.shape != (B, P, V) or not bool(
                        jnp.allclose(out, ref, atol=atol, rtol=rtol)):
                    ok = False
    if ok:
        print("KERNEL_OK")
    else:
        print("MISMATCH")
</pallas_src>

<mosaic_0001>
module attributes {stable_mosaic.version = 11 : i64} {
  func.func @_shared_kernel(%arg0: i32, %arg1: memref<1x8x4xf32, #tpu.memory_space<vmem>>, %arg2: memref<12x8xf32, #tpu.memory_space<vmem>>, %arg3: memref<12x1xf32, #tpu.memory_space<vmem>>, %arg4: memref<1x12x4xf32, #tpu.memory_space<vmem>>) attributes {dimension_semantics = [#tpu.dimension_semantics<parallel>], iteration_bounds = array<i64: 2>, scalar_prefetch = 0 : i64, scratch_operands = 0 : i64, tpu.core_type = #tpu.core_type<tc>, window_params = [{transform_indices = @transform_0, window_bounds = array<i64: 1, 8, 4>}, {pipeline_mode = #tpu.pipeline_mode<synchronous>, transform_indices = @transform_1, window_bounds = array<i64: 12, 8>}, {pipeline_mode = #tpu.pipeline_mode<synchronous>, transform_indices = @transform_2, window_bounds = array<i64: 12, 1>}, {transform_indices = @transform_3, window_bounds = array<i64: 1, 12, 4>}]} {
    %c0 = arith.constant 0 : index
    %c0_0 = arith.constant 0 : index
    %0 = vector.load %arg2[%c0, %c0_0] : memref<12x8xf32, #tpu.memory_space<vmem>>, vector<12x8xf32>
    %c0_1 = arith.constant 0 : index
    %c0_2 = arith.constant 0 : index
    %1 = vector.load %arg3[%c0_1, %c0_2] : memref<12x1xf32, #tpu.memory_space<vmem>>, vector<12x1xf32>
    %c0_3 = arith.constant 0 : index
    %c0_4 = arith.constant 0 : index
    %c0_5 = arith.constant 0 : index
    %2 = vector.load %arg1[%c0_3, %c0_4, %c0_5] : memref<1x8x4xf32, #tpu.memory_space<vmem>>, vector<1x8x4xf32>
    %3 = vector.shape_cast %2 : vector<1x8x4xf32> to vector<8x4xf32>
    %cst = arith.constant dense<0.000000e+00> : vector<12x4xf32>
    %4 = tpu.matmul %0, %3, %cst {dimension_numbers = #tpu.dot_dimension_numbers<[1], [0], [0], [1], [0, 0, 1, 1], [], []>} : vector<12x8xf32>, vector<8x4xf32>, vector<12x4xf32> -> vector<12x4xf32>
    %5 = vector.broadcast %1 : vector<12x1xf32> to vector<12x4xf32>
    %6 = arith.addf %4, %5 : vector<12x4xf32>
    %c0_6 = arith.constant 0 : index
    %c0_7 = arith.constant 0 : index
    %c0_8 = arith.constant 0 : index
    %7 = vector.load %arg4[%c0_6, %c0_7, %c0_8] : memref<1x12x4xf32, #tpu.memory_space<vmem>>, vector<1x12x4xf32>
    %8 = vector.shape_cast %7 : vector<1x12x4xf32> to vector<12x4xf32>
    %9 = vector.shape_cast %6 : vector<12x4xf32> to vector<1x12x4xf32>
    tpu.vector_store %arg4[%c0_6, %c0_7, %c0_8], %9 {strides = array<i32>} : memref<1x12x4xf32, #tpu.memory_space<vmem>>, vector<1x12x4xf32>,
    return
  }
  func.func @transform_0(%arg0: i32) -> (i32, i32, i32) {
    %c0_i32 = arith.constant 0 : i32
    %c0_i32_0 = arith.constant 0 : i32
    %c0_i32_1 = arith.constant 0 : i32
    return %arg0, %c0_i32, %c0_i32_0 : i32, i32, i32
  }
  func.func @transform_1(%arg0: i32) -> (i32, i32) {
    %c0_i32 = arith.constant 0 : i32
    %c0_i32_0 = arith.constant 0 : i32
    %c0_i32_1 = arith.constant 0 : i32
    return %c0_i32, %c0_i32_0 : i32, i32
  }
  func.func @transform_2(%arg0: i32) -> (i32, i32) {
    %c0_i32 = arith.constant 0 : i32
    %c0_i32_0 = arith.constant 0 : i32
    %c0_i32_1 = arith.constant 0 : i32
    return %c0_i32, %c0_i32_0 : i32, i32
  }
  func.func @transform_3(%arg0: i32) -> (i32, i32, i32) {
    %c0_i32 = arith.constant 0 : i32
    %c0_i32_0 = arith.constant 0 : i32
    %c0_i32_1 = arith.constant 0 : i32
    return %arg0, %c0_i32, %c0_i32_0 : i32, i32, i32
  }
}

</mosaic_0001>

<bundles_post_ra>
// kernel: ltsf_linear_forward.1
= control target key start
LH: loop header
LB: loop body
LE: loop exit
PB: predicated region body
PF: predicated region fallthrough
CT: control target
= control target key end

     0   :  { %s384_s12 = smov 0   ;;  %s413_s0 = inlined_call_operand.vmem [shape: f32[2,8,4], index: 0, kind: input, shape index: {}]   ;;  %s414_s1 = inlined_call_operand.vmem [shape: f32[12,8], index: 1, kind: input, shape index: {}]   ;;  %s415_s2 = inlined_call_operand.vmem [shape: f32[12,1], index: 2, kind: input, shape index: {}]   ;;  %s416_s3 = inlined_call_operand.vmem [shape: f32[2,12,4], index: 3, kind: output, shape index: {}]  }
   0x1 LB: > { %s324_s13 = sadd.s32 4294967295, %s361_s12   ;;  %p328_p0 = scmp.ge.s32.totalorder %s361_s12, 1  ;;  %s361_s12 = sphi %s384_s12, %s13_s12  }
   0x2   : > { %p136_p1 = scmp.lt.s32.totalorder %s361_s12, 3 }
   0x4   : > { %p137_p2 = pnand %p328_p0, %p136_p1 }
   0x5   : > { %p159_p3 = scmp.lt.s32.totalorder (!%p137_p2), %s324_s13, 1  ;;  %v168_v0 = vld [vmem:[%s414_s1] sm:$0xff] (!%p137_p2)  ;;  %vm183_vm0 = vcmask (!%p137_p2), 64512   ;;  %v363_v1 = vmov (!%p137_p2), 0   ;;  %v171_v3 = vld [vmem:[%s415_s2 + $0x8] sm:$0xf] (!%p137_p2) }
   0x6   : > { %140 = sbr.rel (%p137_p2) target bundleno = 235 (0xeb), region = 32  ;;  %342 = vmatprep.mubr.msk.f32.mxu0 (!%p137_p2), %vm183_vm0, %v168_v0  ;;  %354 = vset.pattern.permute.xlu0 (!%p137_p2), %v363_v1  ;;  %v170_v2 = vld [vmem:[%s415_s2] sm:$0xff] (!%p137_p2)  ;;  %v169_v5 = vld [vmem:[%s414_s1 + $0x8] sm:$0xf] (!%p137_p2)  ;;  %vm267_vm1 = vcmask (!%p137_p2), 27648   ;;  %vm265_vm2 = vcmask (!%p137_p2), 31744  }
   0x7   : > { %175 = vperm.xlu0 (!%p137_p2), %354, %v170_v2  }
   0xb   : > { %180 = vperm.xlu0 (!%p137_p2), %354, %v171_v3  }
   0xd   : > { %s418_s13 = smov (!%p159_p3, %s324_s13), 1 }
   0xe   : > { %s329_s20 = sshll.u32 %s418_s13, 3  ;;  %s336_s26 = sshll.u32 %s418_s13, 4 }
   0xf   : > { %s162_s23 = scalar_lea.vmem %s413_s0, %s329_s20  ;;  %s167_s29 = scalar_lea.vmem %s416_s3, %s336_s26 }
  0x10   : > { %v172_v4 = vld [vmem:[%s162_s23] sm:$0xff] }
  0x11   : > { %340 = vmatprep.subr.mxu0 %v172_v4 }
  0x12   : > { %341 = vmatpush3.msra.mxu0 %v172_v4 }
  0x13   : > { %343 = vmatmul.mubr.msk.f32.vlgmr.msra.gmra.mrb[0].mxu0 %vm183_vm0, %v169_v5 }
  0x86   : > { %v176_v6 = vpop.permute.xlu0 %175 }
  0x8a   : > { %v181_v7 = vpop.permute.xlu0 %180 }
  0xe6   : > { %v344_v8 = vpop.f32.mrb[0].mxu0 }
  0xe7   : > { %v262_v9 = vadd.f32 %v344_v8, %v181_v7  ;;  %v256_v10 = vpop.f32.mrb[1].mxu0 }
  0xe8   : > { %v257_v11 = vadd.f32 %v256_v10, %v176_v6 }
  0xe9   : > { %268 = vst.msk [vmem:[%s167_s29 + $0x8] sm:$0xf] %vm267_vm1, %v262_v9 }
  0xea   : > { %266 = vst.msk [vmem:[%s167_s29] sm:$0xff] %vm265_vm2, %v257_v11 }
  0xeb PF: > { %s13_s12 = sadd.s32 1, %s361_s12  }
  0xec   : > { %p10_p4 = scmp.ge.s32.totalorder %s13_s12, 4  }
  0xee   :  { %12 = sbr.rel (!%p10_p4) target bundleno = 1 (0x1), region = 62 }

</bundles_post_ra>
